<compile_context>
chip_gen: v7x
topology: tpu7x:2x2x1
jax: 0.10.0
libtpu: 0.0.40
codegen_flags: <defaults>
</compile_context>

<pallas_src>
import functools
import math

import jax
import jax.numpy as jnp
from jax import lax
from jax.experimental import pallas as pl
from jax.experimental.pallas import tpu as pltpu


def _round_up(x: int, m: int) -> int:
    return (x + m - 1) // m * m


# ---------------------------------------------------------------------------
# Kernel 1: normalize + concat + fold 1/sqrt(T) + bf16 cast + positives.
# ---------------------------------------------------------------------------
def _normalize_kernel(z1_ref, z2_ref, zn_ref, pos_ref, *, inv_sqrt_temp: float):
    scale = jnp.float32(inv_sqrt_temp)

    def norm(x):
        ssq = jnp.sum(x * x, axis=1, keepdims=True)
        # F.normalize: x / max(||x||, 1e-12) == x * rsqrt(max(ssq, 1e-24)).
        return x * (lax.rsqrt(jnp.maximum(ssq, jnp.float32(1e-24))) * scale)

    n1 = norm(z1_ref[...].astype(jnp.float32))
    n2 = norm(z2_ref[...].astype(jnp.float32))
    zn_ref[0] = n1.astype(zn_ref.dtype)
    zn_ref[1] = n2.astype(zn_ref.dtype)
    # Positive logit per pair: <z1n, z2n> / T (1/sqrt(T) folded into each side).
    pos_ref[...] = jnp.sum(n1 * n2, axis=1, keepdims=True)


# ---------------------------------------------------------------------------
# Kernel 2: per-row logsumexp with static max = 1/T and analytic corrections.
# Invariants (documented per review): operands stay L2-normalized with the
# temperature fold in the operands; padded rows are exact zeros.
# ---------------------------------------------------------------------------
def _lse_kernel(zr_ref, zc_ref, o_ref, l_ref, *,
                rtile: int, ctile: int, cpanel: int,
                b_pad: int, batch: int, inv_temp: float):
    i = pl.program_id(0)
    p = pl.program_id(1)
    m = jnp.float32(inv_temp)                 # static bound on every logit
    n_sub = cpanel // ctile

    @pl.when(p == 0)
    def _init():
        l_ref[...] = jnp.zeros_like(l_ref)

    def body(c, acc):
        start = pl.multiple_of(c * ctile, ctile)
        # (rtile, ctile) similarity sub-tile on the MXU; bf16 in, f32 acc.
        s = lax.dot_general(
            zr_ref[...], zc_ref[pl.ds(start, ctile), :],
            dimension_numbers=(((1,), (1,)), ((), ())),
            preferred_element_type=jnp.float32)
        return acc + jnp.sum(jnp.exp(s - m), axis=1, keepdims=True)

    l_ref[...] += lax.fori_loop(0, n_sub, body,
                                jnp.zeros((rtile, 1), jnp.float32))

    @pl.when(p == pl.num_programs(1) - 1)
    def _finalize():
        zr = zr_ref[...].astype(jnp.float32)
        diag = jnp.sum(zr * zr, axis=1, keepdims=True)   # == sim[i, i]
        l = l_ref[...] - jnp.exp(diag - m)               # remove masked diagonal
        n_pad_cols = 2 * (b_pad - batch)                 # static Python int
        if n_pad_cols:
            # padded columns are exact zero rows -> each contributed exp(-1/T)
            l = l - jnp.float32(n_pad_cols) * jnp.exp(-m)
        lse = m + jnp.log(l)
        row = lax.broadcasted_iota(jnp.int32, (rtile, 1), 0) + i * rtile
        row_h = jnp.where(row >= b_pad, row - b_pad, row)
        o_ref[...] = jnp.where(row_h < batch, lse, 0.0)  # zero padded rows


# ---------------------------------------------------------------------------
# Wrapper
# ---------------------------------------------------------------------------
def _ntxent_forward(z1: jax.Array, z2: jax.Array, temperature: float = 0.5):
    assert z1.ndim == 2 and z1.shape == z2.shape
    batch, d = z1.shape
    temperature = float(temperature)

    d_pad = _round_up(d, 128)
    b_pad = _round_up(batch, 64)
    n_pad = 2 * b_pad

    # ---- per-generation VMEM budget (v7x has 64 MiB/TC, v5e/v6e 128 MiB) ---
    try:
        vmem_cap = int(pltpu.get_tpu_info().vmem_capacity_bytes)
    except Exception:
        vmem_cap = 64 * 1024 * 1024            # conservative (v7x-sized)
    vmem_limit = int(min(vmem_cap * 4 // 5, 100 * 1024 * 1024))
    budget = vmem_limit * 3 // 4               # headroom for estimate slack

    # ---- tile choices -------------------------------------------------------
    if n_pad >= 1024 and n_pad % 256 == 0:
        rtile = 256
    elif n_pad >= 256:
        rtile = 128
    else:
        rtile = 64                              # n_pad == 128 -> 2 row tiles (v7x)
    ctile = 256 if n_pad % 256 == 0 else 128

    def k2_bytes(cpanel):
        return (2 * rtile * d_pad * 2           # row operand, double-buffered bf16
                + 2 * cpanel * d_pad * 2        # column operand, double-buffered
                + 6 * rtile * ctile * 4         # f32 temporaries (s, exp, ...)
                + 8 * rtile * 4)                # scratch + output

    while k2_bytes(ctile) > budget and (ctile > 128 or rtile > 64):
        if ctile > 128:
            ctile //= 2
        else:
            rtile //= 2

    # Column operand: fully VMEM-resident when it fits (DMA'd once because its
    # block index never changes); otherwise the widest panel dividing n_pad.
    cpanel = ctile
    cand = n_pad
    while cand >= ctile:
        if n_pad % cand == 0 and cand % ctile == 0 and k2_bytes(cand) <= budget:
            cpanel = cand
            break
        cand //= 2

    gi = n_pad // rtile
    pj = n_pad // cpanel

    # ---- pad inputs (padded rows are exact zeros) ---------------------------
    def pad2(x):
        if x.shape == (b_pad, d_pad):
            return x
        return jnp.pad(x, ((0, b_pad - batch), (0, d_pad - d)))

    z1p, z2p = pad2(z1), pad2(z2)

    # ---- kernel 1: normalize + concat + bf16 + positives --------------------
    tr1 = 64
    for cand in (512, 256, 128, 64):
        if b_pad % cand == 0 and cand * d_pad * 40 <= budget:
            tr1 = cand
            break

    zn, pos = pl.pallas_call(
        functools.partial(_normalize_kernel,
                          inv_sqrt_temp=1.0 / math.sqrt(temperature)),
        out_shape=(jax.ShapeDtypeStruct((2, b_pad, d_pad), jnp.bfloat16),
                   jax.ShapeDtypeStruct((b_pad, 1), jnp.float32)),
        grid_spec=pltpu.PrefetchScalarGridSpec(
            num_scalar_prefetch=0,
            grid=(b_pad // tr1,),
            in_specs=[pl.BlockSpec((tr1, d_pad), lambda i: (i, 0)),
                      pl.BlockSpec((tr1, d_pad), lambda i: (i, 0))],
            out_specs=(pl.BlockSpec((2, tr1, d_pad), lambda i: (0, i, 0)),
                       pl.BlockSpec((tr1, 1), lambda i: (i, 0))),
        ),
        compiler_params=pltpu.CompilerParams(
            dimension_semantics=("parallel",),
            vmem_limit_bytes=vmem_limit),
    )(z1p, z2p)
    zn = zn.reshape(n_pad, d_pad)               # free: row-major reshape

    # ---- kernel 2: per-row logsumexp ----------------------------------------
    col_bytes = n_pad * d_pad * 2 * (1 if pj == 1 else gi)
    lse = pl.pallas_call(
        functools.partial(_lse_kernel, rtile=rtile, ctile=ctile, cpanel=cpanel,
                          b_pad=b_pad, batch=batch, inv_temp=1.0 / temperature),
        out_shape=jax.ShapeDtypeStruct((n_pad, 1), jnp.float32),
        grid_spec=pltpu.PrefetchScalarGridSpec(
            num_scalar_prefetch=0,
            grid=(gi, pj),
            in_specs=[pl.BlockSpec((rtile, d_pad), lambda i, p: (i, 0)),
                      pl.BlockSpec((cpanel, d_pad), lambda i, p: (p, 0))],
            out_specs=pl.BlockSpec((rtile, 1), lambda i, p: (i, 0)),
            scratch_shapes=[pltpu.VMEM((rtile, 1), jnp.float32)],
        ),
        compiler_params=pltpu.CompilerParams(
            dimension_semantics=("parallel", "arbitrary"),
            vmem_limit_bytes=vmem_limit),
        cost_estimate=pl.CostEstimate(
            flops=2 * n_pad * n_pad * d_pad,
            transcendentals=n_pad * n_pad,
            bytes_accessed=n_pad * d_pad * 2 + col_bytes + n_pad * 4),
    )(zn, zn)

    # ---- assemble loss exactly like the reference module --------------------
    # labels = [0..B-1, 0..B-1]: rows < B pick the masked diagonal (-1e9),
    # rows >= B pick <z2_k, z1_k>/T (= pos, computed in f32 by kernel 1).
    sum_lse = jnp.sum(lse)
    sum_pos = jnp.sum(pos[:batch, 0])
    total = sum_lse + jnp.float32(batch) * jnp.float32(1.0e9) - sum_pos
    loss = total / jnp.float32(2 * batch)

    lse_valid = jnp.concatenate([lse[:batch, 0], lse[b_pad:b_pad + batch, 0]])
    return loss, lse_valid, pos[:batch, 0]


def ntxent_loss(z1: jax.Array, z2: jax.Array, temperature: float = 0.5) -> jax.Array:
    return _ntxent_forward(z1, z2, temperature)[0]


if __name__ == "__main__":
    key = jax.random.PRNGKey(0)
    k1, k2 = jax.random.split(key)
    B, D, T = 8, 32, 0.5
    z1 = jax.random.normal(k1, (B, D), dtype=jnp.float32)
    z2 = jax.random.normal(k2, (B, D), dtype=jnp.float32)

    fwd = jax.jit(functools.partial(_ntxent_forward, temperature=T))
    loss, lse_k, pos_k = fwd(z1, z2)
    jax.block_until_ready(loss)

    # Plain-JAX f32 reference with the exact PyTorch-module math.
    n = 2 * B
    zc = jnp.concatenate([z1, z2], axis=0)
    zc = zc / jnp.maximum(jnp.linalg.norm(zc, axis=1, keepdims=True), 1e-12)
    sim = (zc @ zc.T) / T
    sim = jnp.where(jnp.eye(n, dtype=bool), -1.0e9, sim)
    labels = jnp.concatenate([jnp.arange(B), jnp.arange(B)])
    lse_ref = jax.scipy.special.logsumexp(sim, axis=1)
    picked_ref = sim[jnp.arange(n), labels]
    ref_loss = jnp.mean(lse_ref - picked_ref)

    # Meaningful-part checks (bf16 MXU operands -> loose tolerance).
    assert jnp.allclose(lse_k, lse_ref, atol=0.1), (lse_k, lse_ref)
    assert jnp.allclose(pos_k, picked_ref[B:], atol=0.1), (pos_k, picked_ref[B:])
    # Full-loss check (dominated by the reference's masked-diagonal positives).
    assert jnp.allclose(loss, ref_loss, rtol=1e-4, atol=1e-2), (loss, ref_loss)
    print("KERNEL_OK")
</pallas_src>

<mosaic_0001>
module attributes {stable_mosaic.version = 11 : i64} {
  func.func @_normalize_kernel(%arg0: i32, %arg1: memref<64x128xf32, #tpu.memory_space<vmem>>, %arg2: memref<64x128xf32, #tpu.memory_space<vmem>>, %arg3: memref<2x64x128xbf16, #tpu.memory_space<vmem>>, %arg4: memref<64x1xf32, #tpu.memory_space<vmem>>) attributes {dimension_semantics = [#tpu.dimension_semantics<parallel>], iteration_bounds = array<i64: 1>, scalar_prefetch = 0 : i64, scratch_operands = 0 : i64, tpu.core_type = #tpu.core_type<tc>, window_params = [{transform_indices = @transform_0, window_bounds = array<i64: 64, 128>}, {transform_indices = @transform_1, window_bounds = array<i64: 64, 128>}, {transform_indices = @transform_2, window_bounds = array<i64: 2, 64, 128>}, {transform_indices = @transform_3, window_bounds = array<i64: 64, 1>}]} {
    %c0 = arith.constant 0 : index
    %c0_0 = arith.constant 0 : index
    %0 = vector.load %arg1[%c0, %c0_0] : memref<64x128xf32, #tpu.memory_space<vmem>>, vector<64x128xf32>
    %1 = arith.mulf %0, %0 : vector<64x128xf32>
    %cst = arith.constant dense<0.000000e+00> : vector<64xf32>
    %2 = vector.multi_reduction <add>, %1, %cst [1] : vector<64x128xf32> to vector<64xf32>
    %3 = vector.shape_cast %2 : vector<64xf32> to vector<64x1xf32>
    %cst_1 = arith.constant 1.000000e-24 : f32
    %4 = vector.broadcast %cst_1 : f32 to vector<64x1xf32>
    %5 = arith.maximumf %3, %4 : vector<64x1xf32>
    %6 = math.rsqrt %5 : vector<64x1xf32>
    %cst_2 = arith.constant 1.41421354 : f32
    %7 = vector.broadcast %cst_2 : f32 to vector<64x1xf32>
    %8 = arith.mulf %6, %7 : vector<64x1xf32>
    %9 = vector.broadcast %8 : vector<64x1xf32> to vector<64x128xf32>
    %10 = arith.mulf %0, %9 : vector<64x128xf32>
    %c0_3 = arith.constant 0 : index
    %c0_4 = arith.constant 0 : index
    %11 = vector.load %arg2[%c0_3, %c0_4] : memref<64x128xf32, #tpu.memory_space<vmem>>, vector<64x128xf32>
    %12 = arith.mulf %11, %11 : vector<64x128xf32>
    %cst_5 = arith.constant dense<0.000000e+00> : vector<64xf32>
    %13 = vector.multi_reduction <add>, %12, %cst_5 [1] : vector<64x128xf32> to vector<64xf32>
    %14 = vector.shape_cast %13 : vector<64xf32> to vector<64x1xf32>
    %cst_6 = arith.constant 1.000000e-24 : f32
    %15 = vector.broadcast %cst_6 : f32 to vector<64x1xf32>
    %16 = arith.maximumf %14, %15 : vector<64x1xf32>
    %17 = math.rsqrt %16 : vector<64x1xf32>
    %cst_7 = arith.constant 1.41421354 : f32
    %18 = vector.broadcast %cst_7 : f32 to vector<64x1xf32>
    %19 = arith.mulf %17, %18 : vector<64x1xf32>
    %20 = vector.broadcast %19 : vector<64x1xf32> to vector<64x128xf32>
    %21 = arith.mulf %11, %20 : vector<64x128xf32>
    %22 = arith.truncf %10 : vector<64x128xf32> to vector<64x128xbf16>
    %c0_8 = arith.constant 0 : index
    %c0_9 = arith.constant 0 : index
    %c0_10 = arith.constant 0 : index
    %23 = vector.load %arg3[%c0_8, %c0_9, %c0_10] : memref<2x64x128xbf16, #tpu.memory_space<vmem>>, vector<1x64x128xbf16>
    %24 = vector.shape_cast %23 : vector<1x64x128xbf16> to vector<64x128xbf16>
    %25 = vector.shape_cast %22 : vector<64x128xbf16> to vector<1x64x128xbf16>
    tpu.vector_store %arg3[%c0_8, %c0_9, %c0_10], %25 {strides = array<i32>} : memref<2x64x128xbf16, #tpu.memory_space<vmem>>, vector<1x64x128xbf16>,
    %26 = arith.truncf %21 : vector<64x128xf32> to vector<64x128xbf16>
    %c1 = arith.constant 1 : index
    %c0_11 = arith.constant 0 : index
    %c0_12 = arith.constant 0 : index
    %27 = vector.load %arg3[%c1, %c0_11, %c0_12] : memref<2x64x128xbf16, #tpu.memory_space<vmem>>, vector<1x64x128xbf16>
    %28 = vector.shape_cast %27 : vector<1x64x128xbf16> to vector<64x128xbf16>
    %29 = vector.shape_cast %26 : vector<64x128xbf16> to vector<1x64x128xbf16>
    tpu.vector_store %arg3[%c1, %c0_11, %c0_12], %29 {strides = array<i32>} : memref<2x64x128xbf16, #tpu.memory_space<vmem>>, vector<1x64x128xbf16>,
    %30 = arith.mulf %10, %21 : vector<64x128xf32>
    %cst_13 = arith.constant dense<0.000000e+00> : vector<64xf32>
    %31 = vector.multi_reduction <add>, %30, %cst_13 [1] : vector<64x128xf32> to vector<64xf32>
    %32 = vector.shape_cast %31 : vector<64xf32> to vector<64x1xf32>
    %c0_14 = arith.constant 0 : index
    %c0_15 = arith.constant 0 : index
    %33 = vector.load %arg4[%c0_14, %c0_15] : memref<64x1xf32, #tpu.memory_space<vmem>>, vector<64x1xf32>
    tpu.vector_store %arg4[%c0_14, %c0_15], %32 {strides = array<i32>} : memref<64x1xf32, #tpu.memory_space<vmem>>, vector<64x1xf32>,
    return
  }
  func.func @transform_0(%arg0: i32) -> (i32, i32) {
    %c0_i32 = arith.constant 0 : i32
    %c0_i32_0 = arith.constant 0 : i32
    return %arg0, %c0_i32 : i32, i32
  }
  func.func @transform_1(%arg0: i32) -> (i32, i32) {
    %c0_i32 = arith.constant 0 : i32
    %c0_i32_0 = arith.constant 0 : i32
    return %arg0, %c0_i32 : i32, i32
  }
  func.func @transform_2(%arg0: i32) -> (i32, i32, i32) {
    %c0_i32 = arith.constant 0 : i32
    %c0_i32_0 = arith.constant 0 : i32
    %c0_i32_1 = arith.constant 0 : i32
    return %c0_i32, %arg0, %c0_i32_0 : i32, i32, i32
  }
  func.func @transform_3(%arg0: i32) -> (i32, i32) {
    %c0_i32 = arith.constant 0 : i32
    %c0_i32_0 = arith.constant 0 : i32
    return %arg0, %c0_i32 : i32, i32
  }
}

module attributes {stable_mosaic.version = 11 : i64} {
  func.func @_lse_kernel(%arg0: i32, %arg1: i32, %arg2: memref<64x128xbf16, #tpu.memory_space<vmem>>, %arg3: memref<128x128xbf16, #tpu.memory_space<vmem>>, %arg4: memref<64x1xf32, #tpu.memory_space<vmem>>, %arg5: memref<64x1xf32, #tpu.memory_space<vmem>>) attributes {dimension_semantics = [#tpu.dimension_semantics<parallel>, #tpu.dimension_semantics<arbitrary>], iteration_bounds = array<i64: 2, 1>, scalar_prefetch = 0 : i64, scratch_operands = 1 : i64, tpu.core_type = #tpu.core_type<tc>, window_params = [{transform_indices = @transform_0, window_bounds = array<i64: 64, 128>}, {transform_indices = @transform_1, window_bounds = array<i64: 128, 128>}, {transform_indices = @transform_2, window_bounds = array<i64: 64, 1>}]} {
    %c0_i32 = arith.constant 0 : i32
    %0 = arith.cmpi eq, %arg1, %c0_i32 : i32
    %1 = arith.extui %0 : i1 to i32
    %c0_i32_0 = arith.constant 0 : i32
    %2 = arith.cmpi ne, %1, %c0_i32_0 : i32
    scf.if %2 {
      %cst_14 = arith.constant 0.000000e+00 : f32
      %22 = vector.broadcast %cst_14 : f32 to vector<64x1xf32>
      %c0_15 = arith.constant 0 : index
      %c0_16 = arith.constant 0 : index
      %23 = vector.load %arg5[%c0_15, %c0_16] : memref<64x1xf32, #tpu.memory_space<vmem>>, vector<64x1xf32>
      tpu.vector_store %arg5[%c0_15, %c0_16], %22 {strides = array<i32>} : memref<64x1xf32, #tpu.memory_space<vmem>>, vector<64x1xf32>,
    } else {
    }
    %c0 = arith.constant 0 : index
    %c0_1 = arith.constant 0 : index
    %3 = vector.load %arg5[%c0, %c0_1] : memref<64x1xf32, #tpu.memory_space<vmem>>, vector<64x1xf32>
    %cst = arith.constant 0.000000e+00 : f32
    %4 = vector.broadcast %cst : f32 to vector<64x1xf32>
    %cst_2 = arith.constant 2.000000e+00 : f32
    %c0_i32_3 = arith.constant 0 : i32
    %c128_i32 = arith.constant 128 : i32
    %5 = arith.muli %c0_i32_3, %c128_i32 : i32
    %6 = tpu.assume_multiple %5, 128 : i32
    %c0_4 = arith.constant 0 : index
    %c0_5 = arith.constant 0 : index
    %7 = vector.load %arg2[%c0_4, %c0_5] : memref<64x128xbf16, #tpu.memory_space<vmem>>, vector<64x128xbf16>
    %8 = arith.index_cast %6 : i32 to index
    %c0_6 = arith.constant 0 : index
    %9 = vector.load %arg3[%8, %c0_6] : memref<128x128xbf16, #tpu.memory_space<vmem>>, vector<128x128xbf16>
    %cst_7 = arith.constant dense<0.000000e+00> : vector<64x128xf32>
    %10 = tpu.matmul %7, %9, %cst_7 {dimension_numbers = #tpu.dot_dimension_numbers<[1], [1], [0], [0], [0, 0, 1, 0], [], []>} : vector<64x128xbf16>, vector<128x128xbf16>, vector<64x128xf32> -> vector<64x128xf32>
    %11 = vector.broadcast %cst_2 : f32 to vector<64x128xf32>
    %12 = arith.subf %10, %11 : vector<64x128xf32>
    %13 = math.exp %12 : vector<64x128xf32>
    %cst_8 = arith.constant dense<0.000000e+00> : vector<64xf32>
    %14 = vector.multi_reduction <add>, %13, %cst_8 [1] : vector<64x128xf32> to vector<64xf32>
    %15 = vector.shape_cast %14 : vector<64xf32> to vector<64x1xf32>
    %16 = arith.addf %4, %15 : vector<64x1xf32>
    %c1_i32 = arith.constant 1 : i32
    %17 = arith.addf %3, %16 : vector<64x1xf32>
    %c0_9 = arith.constant 0 : index
    %c0_10 = arith.constant 0 : index
    %18 = vector.load %arg5[%c0_9, %c0_10] : memref<64x1xf32, #tpu.memory_space<vmem>>, vector<64x1xf32>
    tpu.vector_store %arg5[%c0_9, %c0_10], %17 {strides = array<i32>} : memref<64x1xf32, #tpu.memory_space<vmem>>, vector<64x1xf32>,
    %c0_i32_11 = arith.constant 0 : i32
    %19 = arith.cmpi eq, %arg1, %c0_i32_11 : i32
    %20 = arith.extui %19 : i1 to i32
    %cst_12 = arith.constant 2.000000e+00 : f32
    %c0_i32_13 = arith.constant 0 : i32
    %21 = arith.cmpi ne, %20, %c0_i32_13 : i32
    scf.if %21 {
      %c0_14 = arith.constant 0 : index
      %c0_15 = arith.constant 0 : index
      %22 = vector.load %arg2[%c0_14, %c0_15] : memref<64x128xbf16, #tpu.memory_space<vmem>>, vector<64x128xbf16>
      %23 = arith.extf %22 : vector<64x128xbf16> to vector<64x128xf32>
      %24 = arith.mulf %23, %23 : vector<64x128xf32>
      %cst_16 = arith.constant dense<0.000000e+00> : vector<64xf32>
      %25 = vector.multi_reduction <add>, %24, %cst_16 [1] : vector<64x128xf32> to vector<64xf32>
      %26 = vector.shape_cast %25 : vector<64xf32> to vector<64x1xf32>
      %c0_17 = arith.constant 0 : index
      %c0_18 = arith.constant 0 : index
      %27 = vector.load %arg5[%c0_17, %c0_18] : memref<64x1xf32, #tpu.memory_space<vmem>>, vector<64x1xf32>
      %28 = vector.broadcast %cst_12 : f32 to vector<64x1xf32>
      %29 = arith.subf %26, %28 : vector<64x1xf32>
      %30 = math.exp %29 : vector<64x1xf32>
      %31 = arith.subf %27, %30 : vector<64x1xf32>
      %cst_19 = arith.constant 0.000000e+00 : f32
      %32 = arith.subf %cst_19, %cst_12 : f32
      %33 = math.exp %32 : f32
      %cst_20 = arith.constant 1.120000e+02 : f32
      %34 = arith.mulf %cst_20, %33 : f32
      %35 = vector.broadcast %34 : f32 to vector<64x1xf32>
      %36 = arith.subf %31, %35 : vector<64x1xf32>
      %37 = math.log %36 : vector<64x1xf32>
      %38 = vector.broadcast %cst_12 : f32 to vector<64x1xf32>
      %39 = arith.addf %38, %37 : vector<64x1xf32>
      %40 = tpu.iota {dimensions = array<i32: 0>} : vector<64x1xi32>
      %c64_i32 = arith.constant 64 : i32
      %41 = arith.muli %arg0, %c64_i32 : i32
      %42 = vector.broadcast %41 : i32 to vector<64x1xi32>
      %43 = arith.addi %40, %42 : vector<64x1xi32>
      %c64_i32_21 = arith.constant 64 : i32
      %44 = vector.broadcast %c64_i32_21 : i32 to vector<64x1xi32>
      %45 = arith.cmpi sge, %43, %44 : vector<64x1xi32>
      %c64_i32_22 = arith.constant 64 : i32
      %46 = vector.broadcast %c64_i32_22 : i32 to vector<64x1xi32>
      %47 = arith.subi %43, %46 : vector<64x1xi32>
      %48 = arith.select %45, %47, %43 : vector<64x1xi1>, vector<64x1xi32>
      %c8_i32 = arith.constant 8 : i32
      %49 = vector.broadcast %c8_i32 : i32 to vector<64x1xi32>
      %50 = arith.cmpi slt, %48, %49 : vector<64x1xi32>
      %cst_23 = arith.constant 0.000000e+00 : f32
      %51 = vector.broadcast %cst_23 : f32 to vector<64x1xf32>
      %52 = arith.select %50, %39, %51 : vector<64x1xi1>, vector<64x1xf32>
      %c0_24 = arith.constant 0 : index
      %c0_25 = arith.constant 0 : index
      %53 = vector.load %arg4[%c0_24, %c0_25] : memref<64x1xf32, #tpu.memory_space<vmem>>, vector<64x1xf32>
      tpu.vector_store %arg4[%c0_24, %c0_25], %52 {strides = array<i32>} : memref<64x1xf32, #tpu.memory_space<vmem>>, vector<64x1xf32>,
    } else {
    }
    return
  }
  func.func @transform_0(%arg0: i32, %arg1: i32) -> (i32, i32) {
    %c0_i32 = arith.constant 0 : i32
    %c0_i32_0 = arith.constant 0 : i32
    return %arg0, %c0_i32 : i32, i32
  }
  func.func @transform_1(%arg0: i32, %arg1: i32) -> (i32, i32) {
    %c0_i32 = arith.constant 0 : i32
    %c0_i32_0 = arith.constant 0 : i32
    return %arg1, %c0_i32 : i32, i32
  }
  func.func @transform_2(%arg0: i32, %arg1: i32) -> (i32, i32) {
    %c0_i32 = arith.constant 0 : i32
    %c0_i32_0 = arith.constant 0 : i32
    return %arg0, %c0_i32 : i32, i32
  }
}

</mosaic_0001>

<bundles_post_ra>
// kernel: _ntxent_forward.2
= control target key start
LH: loop header
LB: loop body
LE: loop exit
PB: predicated region body
PF: predicated region fallthrough
CT: control target
= control target key end

     0   :  { %vm246_vm0 = vcmask 7168   ;;  %s590_s0 = inlined_call_operand.vmem [shape: f32[64,128], index: 0, kind: input, shape index: {}]   ;;  %s591_s1 = inlined_call_operand.vmem [shape: f32[64,128], index: 1, kind: input, shape index: {}]   ;;  %s592_s2 = inlined_call_operand.vmem [shape: bf16[2,64,128], index: 2, kind: output, shape index: {0}]   ;;  %s593_s3 = inlined_call_operand.vmem [shape: f32[64,1], index: 3, kind: output, shape index: {1}]  }
   0x1   :  { %v405_v0 = vld [vmem:[%s590_s0 + $0x10] sm:$0xff]  ;;  %v410_v1 = vld [vmem:[%s590_s0] sm:$0xff]  ;;  %v415_v2 = vld [vmem:[%s590_s0 + $0x18] sm:$0xff] }
   0x2   :  { %v23_v3 = vmul.f32 %v405_v0, %v405_v0  ;;  %v21_v4 = vmul.f32 %v410_v1, %v410_v1  ;;  %v424_v5 = vld [vmem:[%s590_s0 + $0x8] sm:$0xff]  ;;  %v24_v6 = vmul.f32 %v415_v2, %v415_v2  ;;  %v438_v9 = vld [vmem:[%s590_s0 + $0x20] sm:$0xff]  ;;  %v447_v12 = vld [vmem:[%s590_s0 + $0x38] sm:$0xff] }
   0x3   :  { %v22_v7 = vmul.f32 %v424_v5, %v424_v5  ;;  %v433_v8 = vld [vmem:[%s590_s0 + $0x28] sm:$0xff]  ;;  %v25_v11 = vmul.f32 %v438_v9, %v438_v9  ;;  %v452_v13 = vld [vmem:[%s590_s0 + $0x30] sm:$0xff]  ;;  %v28_v14 = vmul.f32 %v447_v12, %v447_v12  ;;  %v466_v17 = vld [vmem:[%s591_s1] sm:$0xff] }
   0x4   :  { %33 = vadd.xlane.f32.xlu1 %v23_v3  ;;  %29 = vadd.xlane.f32.xlu0 %v21_v4  ;;  %v26_v10 = vmul.f32 %v433_v8, %v433_v8  ;;  %v27_v15 = vmul.f32 %v452_v13, %v452_v13  ;;  %v461_v16 = vld [vmem:[%s591_s1 + $0x8] sm:$0xff]  ;;  %v85_v19 = vmul.f32 %v466_v17, %v466_v17  ;;  %v475_v20 = vld [vmem:[%s591_s1 + $0x18] sm:$0xff]  ;;  %v480_v21 = vld [vmem:[%s591_s1 + $0x10] sm:$0xff] }
   0x5   :  { %v86_v18 = vmul.f32 %v461_v16, %v461_v16  ;;  %v88_v22 = vmul.f32 %v475_v20, %v475_v20  ;;  %v87_v23 = vmul.f32 %v480_v21, %v480_v21  ;;  %v489_v24 = vld [vmem:[%s591_s1 + $0x28] sm:$0xff]  ;;  %v494_v25 = vld [vmem:[%s591_s1 + $0x20] sm:$0xff]  ;;  %v503_v28 = vld [vmem:[%s591_s1 + $0x38] sm:$0xff] }
   0x6   :  { %v90_v26 = vmul.f32 %v489_v24, %v489_v24  ;;  %v89_v27 = vmul.f32 %v494_v25, %v494_v25  ;;  %v508_v29 = vld [vmem:[%s591_s1 + $0x30] sm:$0xff]  ;;  %v92_v30 = vmul.f32 %v503_v28, %v503_v28 }
   0x7   :  { %v91_v31 = vmul.f32 %v508_v29, %v508_v29 }
   0x8   :  { %35 = vadd.xlane.f32.xlu1 %v24_v6  ;;  %31 = vadd.xlane.f32.xlu0 %v22_v7 }
   0xc   :  { %39 = vadd.xlane.f32.xlu1 %v26_v10  ;;  %37 = vadd.xlane.f32.xlu0 %v25_v11 }
  0x10   :  { %43 = vadd.xlane.f32.xlu1 %v28_v14  ;;  %41 = vadd.xlane.f32.xlu0 %v27_v15 }
  0x14   :  { %95 = vadd.xlane.f32.xlu1 %v86_v18  ;;  %93 = vadd.xlane.f32.xlu0 %v85_v19 }
  0x18   :  { %99 = vadd.xlane.f32.xlu1 %v88_v22  ;;  %97 = vadd.xlane.f32.xlu0 %v87_v23 }
  0x1c   :  { %103 = vadd.xlane.f32.xlu1 %v90_v26  ;;  %101 = vadd.xlane.f32.xlu0 %v89_v27 }
  0x20   :  { %107 = vadd.xlane.f32.xlu1 %v92_v30  ;;  %105 = vadd.xlane.f32.xlu0 %v91_v31 }
  0x91   :  { %v34_v32 = vpop.xlane.xlu1 %33  ;;  %v30_v33 = vpop.xlane.xlu0 %29 }
  0x92   :  { %v47_v34 = vmax.f32 %v34_v32, 1e-24  ;;  %v45_v35 = vmax.f32 %v30_v33, 1e-24 }
  0x94   :  { %350 = vrsqrt.f32 %v47_v34 }
  0x95   :  { %352 = vrsqrt.f32 %v45_v35  ;;  %v36_v36 = vpop.xlane.xlu1 %35  ;;  %v32_v37 = vpop.xlane.xlu0 %31 }
  0x96   :  { %v48_v38 = vmax.f32 %v36_v36, 1e-24  ;;  %v46_v39 = vmax.f32 %v32_v37, 1e-24 }
  0x98   :  { %354 = vrsqrt.f32 %v48_v38 }
  0x99   :  { %356 = vrsqrt.f32 %v46_v39  ;;  %v40_v40 = vpop.xlane.xlu1 %39  ;;  %v38_v41 = vpop.xlane.xlu0 %37 }
  0x9a   :  { %v50_v42 = vmax.f32 %v40_v40, 1e-24  ;;  %v49_v43 = vmax.f32 %v38_v41, 1e-24 }
  0x9c   :  { %358 = vrsqrt.f32 %v50_v42 }
  0x9d   :  { %360 = vrsqrt.f32 %v49_v43  ;;  %v44_v44 = vpop.xlane.xlu1 %43  ;;  %v42_v45 = vpop.xlane.xlu0 %41 }
  0x9e   :  { %v351_v46 = vpop.eup %350  ;;  %v52_v47 = vmax.f32 %v44_v44, 1e-24  ;;  %v51_v48 = vmax.f32 %v42_v45, 1e-24 }
  0x9f   :  { %v353_v49 = vpop.eup %352  ;;  %v63_v50 = vmul.f32 1.4142135, %v351_v46 }
  0xa0   :  { %362 = vrsqrt.f32 %v52_v47  ;;  %v61_v54 = vmul.f32 1.4142135, %v353_v49 }
  0xa1   :  { %364 = vrsqrt.f32 %v51_v48  ;;  %v96_v51 = vpop.xlane.xlu1 %95  ;;  %v94_v52 = vpop.xlane.xlu0 %93  ;;  %v516_v63 = vmul.f32 %v63_v50, %v405_v0 }
  0xa2   :  { %v355_v53 = vpop.eup %354  ;;  %v110_v55 = vmax.f32 %v96_v51, 1e-24  ;;  %v109_v56 = vmax.f32 %v94_v52, 1e-24  ;;  %v69_v10 = vmul.f32 %v61_v54, %v410_v1 }
  0xa3   :  { %v357_v57 = vpop.eup %356  ;;  %v64_v58 = vmul.f32 1.4142135, %v355_v53 }
  0xa4   :  { %v62_v59 = vmul.f32 1.4142135, %v357_v57  ;;  %366 = vrsqrt.f32 %v110_v55 }
  0xa5   :  { %368 = vrsqrt.f32 %v109_v56  ;;  %v100_v60 = vpop.xlane.xlu1 %99  ;;  %v98_v61 = vpop.xlane.xlu0 %97  ;;  %v72_v62 = vmul.f32 %v64_v58, %v415_v2 }
  0xa6   :  { %v359_v3 = vpop.eup %358  ;;  %v112_v4 = vmax.f32 %v100_v60, 1e-24  ;;  %v111_v6 = vmax.f32 %v98_v61, 1e-24  ;;  %v70_v7 = vmul.f32 %v62_v59, %v424_v5 }
  0xa7   :  { %v361_v11 = vpop.eup %360  ;;  %v66_v14 = vmul.f32 1.4142135, %v359_v3  ;;  %v311_v15 = vpack.c.bf16 %v72_v62, %v516_v63 }
  0xa8   :  { %v65_v18 = vmul.f32 1.4142135, %v361_v11  ;;  %370 = vrsqrt.f32 %v112_v4  ;;  %v306_v19 = vpack.c.bf16 %v70_v7, %v69_v10 }
  0xa9   :  { %372 = vrsqrt.f32 %v111_v6  ;;  %v104_v22 = vpop.xlane.xlu1 %103  ;;  %v102_v2 = vpop.xlane.xlu0 %101  ;;  %343 = vst [vmem:[%s592_s2 + $0x8] sm:$0xff] %v311_v15   ;;  %v74_v0 = vmul.f32 %v66_v14, %v433_v8 }
  0xaa   :  { %v363_v23 = vpop.eup %362  ;;  %v114_v5 = vmax.f32 %v104_v22, 1e-24  ;;  %v113_v26 = vmax.f32 %v102_v2, 1e-24  ;;  %307 = vst [vmem:[%s592_s2] sm:$0xff] %v306_v19   ;;  %v73_v1 = vmul.f32 %v65_v18, %v438_v9 }
  0xab   :  { %v365_v27 = vpop.eup %364  ;;  %v68_v30 = vmul.f32 1.4142135, %v363_v23 }
  0xac   :  { %v67_v31 = vmul.f32 1.4142135, %v365_v27  ;;  %374 = vrsqrt.f32 %v114_v5  ;;  %v316_v32 = vpack.c.bf16 %v74_v0, %v73_v1 }
  0xad   :  { %376 = vrsqrt.f32 %v113_v26  ;;  %v108_v33 = vpop.xlane.xlu1 %107  ;;  %v106_v34 = vpop.xlane.xlu0 %105  ;;  %v76_v35 = vmul.f32 %v68_v30, %v447_v12 }
  0xae   :  { %v367_v8 = vpop.eup %366  ;;  %v116_v36 = vmax.f32 %v108_v33, 1e-24  ;;  %v115_v37 = vmax.f32 %v106_v34, 1e-24  ;;  %344 = vst [vmem:[%s592_s2 + $0x10] sm:$0xff] %v316_v32   ;;  %v75_v38 = vmul.f32 %v67_v31, %v452_v13 }
  0xaf   :  { %v369_v9 = vpop.eup %368  ;;  %v126_v39 = vmul.f32 1.4142135, %v367_v8 }
  0xb0   :  { %v125_v40 = vmul.f32 1.4142135, %v369_v9  ;;  %378 = vrsqrt.f32 %v116_v36  ;;  %v321_v41 = vpack.c.bf16 %v76_v35, %v75_v38 }
  0xb1   :  { %380 = vrsqrt.f32 %v115_v37  ;;  %v134_v42 = vmul.f32 %v126_v39, %v461_v16 }
  0xb2   :  { %v371_v43 = vpop.eup %370  ;;  %v133_v12 = vmul.f32 %v125_v40, %v466_v17  ;;  %345 = vst [vmem:[%s592_s2 + $0x18] sm:$0xff] %v321_v41  }
  0xb3   :  { %v373_v44 = vpop.eup %372  ;;  %v128_v45 = vmul.f32 1.4142135, %v371_v43  ;;  %v223_v46 = vmul.f32 %v134_v42, %v70_v7 }
  0xb4   :  { %v127_v47 = vmul.f32 1.4142135, %v373_v44  ;;  %v222_v13 = vmul.f32 %v133_v12, %v69_v10  ;;  %v326_v48 = vpack.c.bf16 %v134_v42, %v133_v12 }
  0xb5   :  { %232 = vadd.xlane.f32.xlu1 %v223_v46  ;;  %v136_v49 = vmul.f32 %v128_v45, %v475_v20 }
  0xb6   :  { %v375_v50 = vpop.eup %374  ;;  %230 = vadd.xlane.f32.xlu0 %v222_v13  ;;  %346 = vst [vmem:[%s592_s2 + $0x20] sm:$0xff] %v326_v48   ;;  %v135_v16 = vmul.f32 %v127_v47, %v480_v21 }
  0xb7   :  { %v377_v17 = vpop.eup %376  ;;  %v130_v51 = vmul.f32 1.4142135, %v375_v50  ;;  %v225_v52 = vmul.f32 %v136_v49, %v72_v62 }
  0xb8   :  { %v129_v53 = vmul.f32 1.4142135, %v377_v17  ;;  %v224_v54 = vmul.f32 %v135_v16, %v516_v63  ;;  %v331_v55 = vpack.c.bf16 %v136_v49, %v135_v16 }
  0xb9   :  { %236 = vadd.xlane.f32.xlu1 %v225_v52  ;;  %v138_v56 = vmul.f32 %v130_v51, %v489_v24 }
  0xba   :  { %v379_v57 = vpop.eup %378  ;;  %234 = vadd.xlane.f32.xlu0 %v224_v54  ;;  %347 = vst [vmem:[%s592_s2 + $0x28] sm:$0xff] %v331_v55   ;;  %v137_v20 = vmul.f32 %v129_v53, %v494_v25 }
  0xbb   :  { %v381_v58 = vpop.eup %380  ;;  %v132_v21 = vmul.f32 1.4142135, %v379_v57  ;;  %v227_v59 = vmul.f32 %v138_v56, %v74_v0 }
  0xbc   :  { %v131_v60 = vmul.f32 1.4142135, %v381_v58  ;;  %v226_v61 = vmul.f32 %v137_v20, %v73_v1  ;;  %v336_v62 = vpack.c.bf16 %v138_v56, %v137_v20 }
  0xbd   :  { %240 = vadd.xlane.f32.xlu1 %v227_v59  ;;  %v140_v63 = vmul.f32 %v132_v21, %v503_v28 }
  0xbe   :  { %238 = vadd.xlane.f32.xlu0 %v226_v61  ;;  %348 = vst [vmem:[%s592_s2 + $0x30] sm:$0xff] %v336_v62   ;;  %v139_v24 = vmul.f32 %v131_v60, %v508_v29 }
  0xbf   :  { %v229_v3 = vmul.f32 %v140_v63, %v76_v35 }
  0xc0   :  { %v228_v4 = vmul.f32 %v139_v24, %v75_v38  ;;  %v341_v6 = vpack.c.bf16 %v140_v63, %v139_v24 }
  0xc1   :  { %244 = vadd.xlane.f32.xlu1 %v229_v3 }
  0xc2   :  { %242 = vadd.xlane.f32.xlu0 %v228_v4  ;;  %349 = vst [vmem:[%s592_s2 + $0x38] sm:$0xff] %v341_v6  }
 0x142   :  { %v233_v25 = vpop.xlane.xlu1 %232 }
 0x143   :  { %248 = vst.msk [vmem:[%s593_s3 + $0x8] sm:$0xff] %vm246_vm0, %v233_v25  ;;  %v231_v28 = vpop.xlane.xlu0 %230 }
 0x144   :  { %247 = vst.msk [vmem:[%s593_s3] sm:$0xff] %vm246_vm0, %v231_v28 }
 0x146   :  { %v237_v29 = vpop.xlane.xlu1 %236 }
 0x147   :  { %250 = vst.msk [vmem:[%s593_s3 + $0x18] sm:$0xff] %vm246_vm0, %v237_v29  ;;  %v235_v7 = vpop.xlane.xlu0 %234 }
 0x148   :  { %249 = vst.msk [vmem:[%s593_s3 + $0x10] sm:$0xff] %vm246_vm0, %v235_v7 }
 0x14a   :  { %v241_v10 = vpop.xlane.xlu1 %240 }
 0x14b   :  { %252 = vst.msk [vmem:[%s593_s3 + $0x28] sm:$0xff] %vm246_vm0, %v241_v10  ;;  %v239_v11 = vpop.xlane.xlu0 %238 }
 0x14c   :  { %251 = vst.msk [vmem:[%s593_s3 + $0x20] sm:$0xff] %vm246_vm0, %v239_v11 }
 0x14e   :  { %v245_v14 = vpop.xlane.xlu1 %244 }
 0x14f   :  { %254 = vst.msk [vmem:[%s593_s3 + $0x38] sm:$0xff] %vm246_vm0, %v245_v14  ;;  %v243_v15 = vpop.xlane.xlu0 %242 }
 0x150   :  { %253 = vst.msk [vmem:[%s593_s3 + $0x30] sm:$0xff] %vm246_vm0, %v243_v15 }

// kernel: _ntxent_forward.3
= control target key start
LH: loop header
LB: loop body
LE: loop exit
PB: predicated region body
PF: predicated region fallthrough
CT: control target
= control target key end

     0   :  { %s944_s9 = smov 0   ;;  %s946_s10 = smov 0   ;;  %s1077_s0 = inlined_call_operand.vmem [shape: bf16[128,128], index: 0, kind: input, shape index: {}, may-alias: {0,1}]   ;;  %s1078_s1 = inlined_call_operand.vmem [shape: bf16[128,128], index: 1, kind: input, shape index: {}, may-alias: {0,1}]   ;;  %s1079_s2 = inlined_call_operand.vmem [shape: f32[128,1], index: 2, kind: output, shape index: {}]  }
   0x1   :  { %s948_s11 = smov 0  }
   0x2 LB: > { %s24_s12 = sadd.s32 1, %s922_s10  ;;  %p696_p0 = scmp.ge.s32.totalorder %s926_s11, 1  ;;  %s926_s11 = sphi %s948_s11, %s12_s11   ;;  %s922_s10 = sphi %s946_s10, %s1081_s10   ;;  %s918_s9 = sphi %s944_s9, %s1080_s9  }
   0x3   : > { %p26_p1 = scmp.ge.s32.totalorder %s24_s12, 2  ;;  %p136_p2 = scmp.lt.s32.totalorder %s926_s11, 3 }
   0x5   : > { %s1083_s12 = smov (%p26_p1, %s24_s12), 0  ;;  %p137_p3 = pnand %p696_p0, %p136_p2 }
   0x6   : > { %v844_v0 = vld [vmem:[%s1078_s1] sm:$0xff] (!%p137_p3)   ;;  %s697_s15 = sshll.u32 (!%p137_p3), %s918_s9, 3  ;;  %v845_v1 = vld [vmem:[%s1078_s1 + $0x8] sm:$0xff] (!%p137_p3)   ;;  %v846_v2 = vld [vmem:[%s1078_s1 + $0x10] sm:$0xff] (!%p137_p3)   ;;  %vm186_vm0 = vcmask (!%p137_p3), 7168   ;;  %v928_v32 = vmov (!%p137_p3), 0.0  }
   0x7   : > { %140 = sbr.rel (%p137_p3) target bundleno = 485 (0x1e5), region = 28  ;;  %p164_p4 = scmp.lt.s32.totalorder (!%p137_p3), %s697_s15, 15  ;;  %779 = vmatprep.subr.bf16.mxu0 (!%p137_p3), %v844_v0  ;;  %803 = vmatprep.subr.bf16.mxu1 (!%p137_p3), %v844_v0  ;;  %v847_v8 = vld [vmem:[%s1078_s1 + $0x18] sm:$0xff] (!%p137_p3)   ;;  %v848_v9 = vld [vmem:[%s1078_s1 + $0x20] sm:$0xff] (!%p137_p3)   ;;  %v849_v10 = vld [vmem:[%s1078_s1 + $0x28] sm:$0xff] (!%p137_p3)   ;;  %189 = vst.msk [vmem:[#allocation2 + $0x10] sm:$0xff] (!%p137_p3), %vm186_vm0, %v928_v32 }
   0x8   : > { %780 = vmatpush3.bf16.xpose.msra.mxu0 (!%p137_p3), %v844_v0  ;;  %811 = vmatpush3.bf16.xpose.msra.mxu1 (!%p137_p3), %v844_v0  ;;  %v850_v11 = vld [vmem:[%s1078_s1 + $0x30] sm:$0xff] (!%p137_p3)   ;;  %v851_v12 = vld [vmem:[%s1078_s1 + $0x38] sm:$0xff] (!%p137_p3)   ;;  %187 = vst.msk [vmem:[#allocation2] sm:$0xff] (!%p137_p3), %vm186_vm0, %v928_v32  ;;  %188 = vst.msk [vmem:[#allocation2 + $0x8] sm:$0xff] (!%p137_p3), %vm186_vm0, %v928_v32  ;;  %s737_s6 = sshll.u32 (!%p137_p3), %s918_s9, 6 }
   0x9   : > { %781 = vmatprep.subr.bf16.mxu0 (!%p137_p3), %v845_v1  ;;  %804 = vmatprep.subr.bf16.mxu1 (!%p137_p3), %v845_v1  ;;  %190 = vst.msk [vmem:[#allocation2 + $0x18] sm:$0xff] (!%p137_p3), %vm186_vm0, %v928_v32  ;;  %191 = vst.msk [vmem:[#allocation2 + $0x20] sm:$0xff] (!%p137_p3), %vm186_vm0, %v928_v32 }
   0xa   : > { %192 = vst.msk [vmem:[#allocation2 + $0x28] sm:$0xff] (!%p137_p3), %vm186_vm0, %v928_v32  ;;  %193 = vst.msk [vmem:[#allocation2 + $0x30] sm:$0xff] (!%p137_p3), %vm186_vm0, %v928_v32 }
   0xb   : > { %194 = vst.msk [vmem:[#allocation2 + $0x38] sm:$0xff] (!%p137_p3), %vm186_vm0, %v928_v32 }
   0xe   : > { %s1085_s15 = smov (!%p164_p4, %s697_s15), 15 }
   0xf   : > { %s698_s18 = sshll.u32 %s1085_s15, 2  ;;  %s700_s7 = sshll.u32 %s1085_s15, 3 }
  0x10   : > { %s977_s21 = scalar_lea.vmem %s1077_s0, %s698_s18  ;;  %782 = vmatpush3.bf16.xpose.msra.mxu0 %v845_v1  ;;  %812 = vmatpush3.bf16.xpose.msra.mxu1 %v845_v1  ;;  %s1045_s13 = scalar_lea.vmem %s1079_s2, %s700_s7 }
  0x11   : > { %v852_v3 = vld [vmem:[%s977_s21] sm:$0xff]   ;;  %v854_v4 = vld [vmem:[%s977_s21 + $0x10] sm:$0xff]   ;;  %783 = vmatprep.subr.bf16.mxu0 %v846_v2  ;;  %805 = vmatprep.subr.bf16.mxu1 %v846_v2  ;;  %v853_v13 = vld [vmem:[%s977_s21 + $0x8] sm:$0xff]  }
  0x12   : > { %795 = vmatprep.mubr.bf16.mxu0 %v852_v3  ;;  %v749_v5 = vld [vmem:[%s977_s21] sm:$0xff]   ;;  %799 = vmatprep.mubr.bf16.mxu1 %v854_v4  ;;  %v855_v14 = vld [vmem:[%s977_s21 + $0x18] sm:$0xff]   ;;  %v764_v15 = vld [vmem:[%s977_s21 + $0x8] sm:$0xff]  }
  0x13   : > { %v750_v6 = vunpack.c.l.bf16 %v749_v5  ;;  %v754_v16 = vunpack.c.l.bf16 %v764_v15  ;;  %v751_v18 = vunpack.c.h.bf16 %v749_v5  ;;  %v755_v20 = vunpack.c.h.bf16 %v764_v15  ;;  %v765_v21 = vld [vmem:[%s977_s21 + $0x10] sm:$0xff]   ;;  %v766_v26 = vld [vmem:[%s977_s21 + $0x18] sm:$0xff]  }
  0x14   : > { %v758_v23 = vunpack.c.l.bf16 %v765_v21  ;;  %v759_v25 = vunpack.c.h.bf16 %v765_v21  ;;  %v762_v28 = vunpack.c.l.bf16 %v766_v26  ;;  %v763_v30 = vunpack.c.h.bf16 %v766_v26  ;;  %v197_v15 = vld [vmem:[#allocation2 + $0x10] sm:$0xff] }
  0x15   : > { %v448_v7 = vmul.f32 %v750_v6, %v750_v6  ;;  %v450_v17 = vmul.f32 %v754_v16, %v754_v16  ;;  %v449_v19 = vmul.f32 %v751_v18, %v751_v18  ;;  %v451_v22 = vmul.f32 %v755_v20, %v755_v20  ;;  %v198_v20 = vld [vmem:[#allocation2 + $0x18] sm:$0xff] }
  0x16   : > { %v452_v24 = vmul.f32 %v758_v23, %v758_v23  ;;  %v453_v27 = vmul.f32 %v759_v25, %v759_v25  ;;  %v454_v29 = vmul.f32 %v762_v28, %v762_v28  ;;  %v455_v31 = vmul.f32 %v763_v30, %v763_v30  ;;  %v195_v25 = vld [vmem:[#allocation2] sm:$0xff] }
  0x17   : > { %456 = vadd.xlane.f32.xlu0 %v448_v7  ;;  %460 = vadd.xlane.f32.xlu1 %v450_v17  ;;  %v544_v18 = vlaneseq }
  0x18   : > { %784 = vmatpush3.bf16.xpose.msra.mxu0 %v846_v2  ;;  %813 = vmatpush3.bf16.xpose.msra.mxu1 %v846_v2 }
  0x19   : > { %785 = vmatprep.subr.bf16.mxu0 %v847_v8  ;;  %806 = vmatprep.subr.bf16.mxu1 %v847_v8 }
  0x1b   : > { %458 = vadd.xlane.f32.xlu0 %v449_v19  ;;  %462 = vadd.xlane.f32.xlu1 %v451_v22 }
  0x1f   : > { %464 = vadd.xlane.f32.xlu0 %v452_v24  ;;  %466 = vadd.xlane.f32.xlu1 %v453_v27 }
  0x20   : > { %786 = vmatpush3.bf16.xpose.msra.mxu0 %v847_v8  ;;  %814 = vmatpush3.bf16.xpose.msra.mxu1 %v847_v8 }
  0x21   : > { %787 = vmatprep.subr.bf16.mxu0 %v848_v9  ;;  %807 = vmatprep.subr.bf16.mxu1 %v848_v9 }
  0x23   : > { %468 = vadd.xlane.f32.xlu0 %v454_v29  ;;  %470 = vadd.xlane.f32.xlu1 %v455_v31  ;;  %v1014_v29 = vshrl.u32 %v544_v18, 7  ;;  %v196_v31 = vld [vmem:[#allocation2 + $0x8] sm:$0xff] }
  0x28   : > { %788 = vmatpush3.bf16.xpose.msra.mxu0 %v848_v9  ;;  %815 = vmatpush3.bf16.xpose.msra.mxu1 %v848_v9 }
  0x29   : > { %789 = vmatprep.subr.bf16.mxu0 %v849_v10  ;;  %808 = vmatprep.subr.bf16.mxu1 %v849_v10 }
  0x30   : > { %790 = vmatpush3.bf16.xpose.msra.mxu0 %v849_v10  ;;  %816 = vmatpush3.bf16.xpose.msra.mxu1 %v849_v10 }
  0x31   : > { %791 = vmatprep.subr.bf16.mxu0 %v850_v11  ;;  %809 = vmatprep.subr.bf16.mxu1 %v850_v11 }
  0x38   : > { %792 = vmatpush3.bf16.xpose.msra.mxu0 %v850_v11  ;;  %817 = vmatpush3.bf16.xpose.msra.mxu1 %v850_v11 }
  0x39   : > { %793 = vmatprep.subr.bf16.mxu0 %v851_v12  ;;  %810 = vmatprep.subr.bf16.mxu1 %v851_v12 }
  0x40   : > { %794 = vmatpush3.bf16.xpose.msra.mxu0 %v851_v12  ;;  %818 = vmatpush3.bf16.xpose.msra.mxu1 %v851_v12 }
  0x47   : > { %796 = vmatmul.mubr.bf16.vlgmr.msra.gmra.mrb[0].mxu0 %v853_v13  ;;  %800 = vmatmul.mubr.bf16.vlgmr.msra.gmra.mrb[0].mxu1 %v855_v14 }
  0xa4   : > { %v457_v1 = vpop.xlane.xlu0 %456  ;;  %v461_v2 = vpop.xlane.xlu1 %460 }
  0xa5   : > { %v723_v7 = vadd.f32 -2.0, %v461_v2  ;;  %v721_v10 = vadd.f32 -2.0, %v457_v1 }
  0xa7   : > { %v492_v11 = vmul.f32 1.442695, %v723_v7  ;;  %v488_v16 = vmul.f32 1.442695, %v721_v10 }
  0xa8   : > { %v459_v3 = vpop.xlane.xlu0 %458  ;;  %v463_v4 = vpop.xlane.xlu1 %462 }
  0xa9   : > { %v724_v8 = vadd.f32 -2.0, %v463_v4  ;;  %v722_v13 = vadd.f32 -2.0, %v459_v3 }
  0xab   : > { %v494_v14 = vmul.f32 1.442695, %v724_v8  ;;  %v490_v22 = vmul.f32 1.442695, %v722_v13 }
  0xac   : > { %v465_v5 = vpop.xlane.xlu0 %464  ;;  %v467_v6 = vpop.xlane.xlu1 %466 }
  0xad   : > { %v725_v17 = vadd.f32 -2.0, %v465_v5  ;;  %v726_v23 = vadd.f32 -2.0, %v467_v6  ;;  %v546_v5 = vadd.s32 8, %v1014_v29 }
  0xaf   : > { %v496_v27 = vmul.f32 1.442695, %v725_v17 }
  0xb0   : > { %v469_v9 = vpop.xlane.xlu0 %468  ;;  %v471_v12 = vpop.xlane.xlu1 %470 }
  0xb1   : > { %v727_v28 = vadd.f32 -2.0, %v469_v9 }
 0x11a   : > { %v797_v33 = vpop.f32.mrb[0].mxu0  ;;  %v801_v34 = vpop.f32.mrb[0].mxu1 }
 0x11b   : > { %v715_v35 = vadd.f32 -2.0, %v797_v33  ;;  %v333_v36 = vpop.f32.mrb[1].mxu0  ;;  %v349_v37 = vpop.f32.mrb[1].mxu1  ;;  %v719_v52 = vadd.f32 -2.0, %v801_v34  ;;  %v498_v33 = vmul.f32 1.442695, %v726_v23 }
 0x11c   : > { %v713_v38 = vadd.f32 -2.0, %v333_v36  ;;  %v798_v39 = vpop.f32.mrb[2].mxu0  ;;  %v802_v40 = vpop.f32.mrb[2].mxu1  ;;  %v717_v44 = vadd.f32 -2.0, %v349_v37  ;;  %v728_v34 = vadd.f32 -2.0, %v471_v12  ;;  %v199_v36 = vld [vmem:[#allocation2 + $0x20] sm:$0xff] }
 0x11d   : > { %v376_v41 = vmul.f32 1.442695, %v715_v35  ;;  %v716_v42 = vadd.f32 -2.0, %v798_v39  ;;  %v336_v43 = vpop.f32.mrb[3].mxu0  ;;  %v352_v48 = vpop.f32.mrb[3].mxu1  ;;  %v720_v53 = vadd.f32 -2.0, %v802_v40 }
 0x11e   : > { %v714_v45 = vadd.f32 -2.0, %v336_v43  ;;  %v372_v46 = vmul.f32 1.442695, %v713_v38  ;;  %v380_v50 = vmul.f32 1.442695, %v717_v44  ;;  %v718_v51 = vadd.f32 -2.0, %v352_v48 }
 0x11f   : > { %856 = vpow2.f32 %v376_v41  ;;  %v378_v47 = vmul.f32 1.442695, %v716_v42  ;;  %v384_v55 = vmul.f32 1.442695, %v719_v52  ;;  %v386_v57 = vmul.f32 1.442695, %v720_v53 }
 0x120   : > { %v374_v49 = vmul.f32 1.442695, %v714_v45  ;;  %v382_v54 = vmul.f32 1.442695, %v718_v51  ;;  %v500_v38 = vmul.f32 1.442695, %v727_v28  ;;  %v1020_v42 = vstv %s737_s6 }
 0x121   : > { %858 = vpow2.f32 %v378_v47  ;;  %v547_v39 = vadd.s32 16, %v1014_v29  ;;  %v200_v41 = vld [vmem:[#allocation2 + $0x28] sm:$0xff]  ;;  %v502_v45 = vmul.f32 1.442695, %v728_v34  ;;  %v548_v47 = vadd.s32 24, %v1014_v29 }
 0x122   : > { %860 = vpow2.f32 %v372_v46  ;;  %v556_v18 = vadd.s32 %v1020_v42, %v546_v5 }
 0x123   : > { %862 = vpow2.f32 %v374_v49  ;;  %v201_v49 = vld [vmem:[#allocation2 + $0x30] sm:$0xff]  ;;  %v557_v53 = vadd.s32 %v1020_v42, %v547_v39 }
 0x124   : > { %864 = vpow2.f32 %v380_v50  ;;  %vm564_vm6 = vcmp.ge.s32.totalorder %v556_v18, 64 }
 0x125   : > { %866 = vpow2.f32 %v382_v54  ;;  %v740_v4 = vadd.s32 4294967232, %v557_v53  ;;  %vm565_vm1 = vcmp.ge.s32.totalorder %v557_v53, 64 }
 0x126   : > { %868 = vpow2.f32 %v384_v55 }
 0x127   : > { %870 = vpow2.f32 %v386_v57  ;;  %v581_v17 = vsel %vm565_vm1, %v740_v4, %v557_v53 }
 0x128   : > { %872 = vpow2.f32 %v492_v11  ;;  %v555_v11 = vadd.s32 %v1020_v42, %v1014_v29  ;;  %vm589_vm3 = vcmp.lt.s32.totalorder %v581_v17, 8 }
 0x129   : > { %v857_v56 = vpop.eup %856  ;;  %874 = vpow2.f32 %v494_v14  ;;  %v549_v14 = vadd.s32 32, %v1014_v29 }
 0x12a   : > { %392 = vadd.xlane.f32.xlu0 %v857_v56  ;;  %876 = vpow2.f32 %v488_v16  ;;  %v202_v56 = vld [vmem:[#allocation2 + $0x38] sm:$0xff]  ;;  %vm563_vm4 = vcmp.ge.s32.totalorder %v555_v11, 64 }
 0x12b   : > { %v859_v58 = vpop.eup %858  ;;  %878 = vpow2.f32 %v490_v22 }
 0x12c   : > { %394 = vadd.xlane.f32.xlu1 %v859_v58  ;;  %v861_v59 = vpop.eup %860  ;;  %880 = vpow2.f32 %v496_v27  ;;  %v559_v27 = vadd.s32 %v1020_v42, %v549_v14 }
 0x12d   : > { %v863_v60 = vpop.eup %862  ;;  %882 = vpow2.f32 %v498_v33  ;;  %v551_v33 = vadd.s32 48, %v1014_v29 }
 0x12e   : > { %388 = vadd.xlane.f32.xlu0 %v861_v59  ;;  %v865_v61 = vpop.eup %864  ;;  %884 = vpow2.f32 %v500_v38  ;;  %vm567_vm7 = vcmp.ge.s32.totalorder %v559_v27, 64 }
 0x12f   : > { %v867_v62 = vpop.eup %866  ;;  %886 = vpow2.f32 %v502_v45 }
 0x130   : > { %390 = vadd.xlane.f32.xlu1 %v863_v60  ;;  %v869_v63 = vpop.eup %868 }
 0x131   : > { %v871_v0 = vpop.eup %870 }
 0x132   : > { %396 = vadd.xlane.f32.xlu0 %v865_v61  ;;  %v873_v44 = vpop.eup %872  ;;  %v558_v61 = vadd.s32 %v1020_v42, %v548_v47 }
 0x133   : > { %v875_v52 = vpop.eup %874 }
 0x134   : > { %398 = vadd.xlane.f32.xlu1 %v867_v62  ;;  %v877_v60 = vpop.eup %876  ;;  %vm566_vm2 = vcmp.ge.s32.totalorder %v558_v61, 64  ;;  %v741_v10 = vadd.s32 4294967232, %v558_v61 }
 0x135   : > { %v879_v3 = vpop.eup %878 }
 0x136   : > { %400 = vadd.xlane.f32.xlu0 %v869_v63  ;;  %v881_v9 = vpop.eup %880 }
 0x137   : > { %v883_v16 = vpop.eup %882 }
 0x138   : > { %402 = vadd.xlane.f32.xlu1 %v871_v0  ;;  %v885_v23 = vpop.eup %884 }
 0x1b7   : > { %v393_v19 = vpop.xlane.xlu0 %392 }
 0x1b8   : > { %v414_v21 = vadd.f32 %v393_v19, %v197_v15 }
 0x1b9   : > { %v395_v24 = vpop.xlane.xlu1 %394 }
 0x1ba   : > { %423 = vst.msk [vmem:[#allocation2 + $0x10] sm:$0xff] %vm186_vm0, %v414_v21  ;;  %v415_v26 = vadd.f32 %v395_v24, %v198_v20  ;;  %v550_v21 = vadd.s32 40, %v1014_v29  ;;  %v582_v24 = vsel %vm566_vm2, %v741_v10, %v558_v61 }
 0x1bb   : > { %v389_v30 = vpop.xlane.xlu0 %388  ;;  %vm590_vm5 = vcmp.lt.s32.totalorder %v582_v24, 8 }
 0x1bc   : > { %424 = vst.msk [vmem:[#allocation2 + $0x18] sm:$0xff] %vm186_vm0, %v415_v26  ;;  %v412_v32 = vadd.f32 %v389_v30, %v195_v25  ;;  %v738_v25 = vadd.s32 4294967232, %v555_v11 }
 0x1bd   : > { %v391_v35 = vpop.xlane.xlu1 %390 }
 0x1be   : > { %421 = vst.msk [vmem:[#allocation2] sm:$0xff] %vm186_vm0, %v412_v32  ;;  %v413_v37 = vadd.f32 %v391_v35, %v196_v31  ;;  %v887_v31 = vpop.eup %886  ;;  %v739_v32 = vadd.s32 4294967232, %v556_v18 }
 0x1bf   : > { %v397_v40 = vpop.xlane.xlu0 %396 }
 0x1c0   : > { %422 = vst.msk [vmem:[#allocation2 + $0x8] sm:$0xff] %vm186_vm0, %v413_v37  ;;  %v416_v43 = vadd.f32 %v397_v40, %v199_v36  ;;  %v560_v36 = vadd.s32 %v1020_v42, %v550_v21  ;;  %v552_v40 = vadd.s32 56, %v1014_v29 }
 0x1c1   : > { %v474_v46 = vld [vmem:[#allocation2 + $0x10] sm:$0xff]  ;;  %v399_v48 = vpop.xlane.xlu1 %398 }
 0x1c2   : > { %v506_v50 = vsub.f32 %v474_v46, %v873_v44  ;;  %425 = vst.msk [vmem:[#allocation2 + $0x20] sm:$0xff] %vm186_vm0, %v416_v43  ;;  %v417_v51 = vadd.f32 %v399_v48, %v200_v41  ;;  %v579_v43 = vsel %vm563_vm4, %v738_v25, %v555_v11  ;;  %v742_v44 = vadd.s32 4294967232, %v559_v27 }
 0x1c3   : > { %v475_v54 = vld [vmem:[#allocation2 + $0x18] sm:$0xff]  ;;  %v401_v55 = vpop.xlane.xlu0 %400  ;;  %v561_v48 = vadd.s32 %v1020_v42, %v551_v33  ;;  %vm568_vm8 = vcmp.ge.s32.totalorder %v560_v36, 64  ;;  %v743_v29 = vadd.s32 4294967232, %v560_v36  ;;  %vm587_vm9 = vcmp.lt.s32.totalorder %v579_v43, 8 }
 0x1c4   : > { %v731_v57 = vadd.f32 -15.157552, %v506_v50  ;;  %v507_v58 = vsub.f32 %v475_v54, %v875_v52  ;;  %426 = vst.msk [vmem:[#allocation2 + $0x28] sm:$0xff] %vm186_vm0, %v417_v51  ;;  %v418_v59 = vadd.f32 %v401_v55, %v201_v49  ;;  %v580_v50 = vsel %vm564_vm6, %v739_v32, %v556_v18 }
 0x1c5   : > { %v472_v62 = vld [vmem:[#allocation2] sm:$0xff]  ;;  %v403_v63 = vpop.xlane.xlu1 %402  ;;  %v562_v54 = vadd.s32 %v1020_v42, %v552_v40  ;;  %vm588_vm10 = vcmp.lt.s32.totalorder %v580_v50, 8  ;;  %vm569_vm11 = vcmp.ge.s32.totalorder %v561_v48, 64 }
 0x1c6   : > { %888 = vlog2.f32 %v731_v57  ;;  %v732_v0 = vadd.f32 -15.157552, %v507_v58  ;;  %v504_v1 = vsub.f32 %v472_v62, %v877_v60  ;;  %427 = vst.msk [vmem:[#allocation2 + $0x30] sm:$0xff] %vm186_vm0, %v418_v59  ;;  %v419_v2 = vadd.f32 %v403_v63, %v202_v56 }
 0x1c7   : > { %v473_v6 = vld [vmem:[#allocation2 + $0x8] sm:$0xff]  ;;  %v583_v56 = vsel %vm567_vm7, %v742_v44, %v559_v27  ;;  %v744_v60 = vadd.s32 4294967232, %v561_v48  ;;  %v584_v62 = vsel %vm568_vm8, %v743_v29, %v560_v36  ;;  %vm570_vm13 = vcmp.ge.s32.totalorder %v562_v54, 64 }
 0x1c8   : > { %890 = vlog2.f32 %v732_v0  ;;  %v729_v7 = vadd.f32 -15.157552, %v504_v1  ;;  %v505_v8 = vsub.f32 %v473_v6, %v879_v3  ;;  %428 = vst.msk [vmem:[#allocation2 + $0x38] sm:$0xff] %vm186_vm0, %v419_v2  ;;  %v745_v1 = vadd.s32 4294967232, %v562_v54 }
 0x1c9   : > { %v476_v12 = vld [vmem:[#allocation2 + $0x20] sm:$0xff]  ;;  %vm591_vm12 = vcmp.lt.s32.totalorder %v583_v56, 8  ;;  %v585_v6 = vsel %vm569_vm11, %v744_v60, %v561_v48  ;;  %vm592_vm14 = vcmp.lt.s32.totalorder %v584_v62, 8 }
 0x1ca   : > { %892 = vlog2.f32 %v729_v7  ;;  %v730_v13 = vadd.f32 -15.157552, %v505_v8  ;;  %v508_v15 = vsub.f32 %v476_v12, %v881_v9  ;;  %v586_v11 = vsel %vm570_vm13, %v745_v1, %v562_v54 }
 0x1cb   : > { %v477_v19 = vld [vmem:[#allocation2 + $0x28] sm:$0xff]  ;;  %vm593_vm15 = vcmp.lt.s32.totalorder %v585_v6, 8  ;;  %vm594_vm1 = vcmp.lt.s32.totalorder %v586_v11, 8 }
 0x1cc   : > { %894 = vlog2.f32 %v730_v13  ;;  %v733_v20 = vadd.f32 -15.157552, %v508_v15  ;;  %v509_v22 = vsub.f32 %v477_v19, %v883_v16 }
 0x1cd   : > { %v478_v26 = vld [vmem:[#allocation2 + $0x30] sm:$0xff] }
 0x1ce   : > { %896 = vlog2.f32 %v733_v20  ;;  %v734_v28 = vadd.f32 -15.157552, %v509_v22  ;;  %v510_v30 = vsub.f32 %v478_v26, %v885_v23 }
 0x1cf   : > { %v479_v34 = vld [vmem:[#allocation2 + $0x38] sm:$0xff] }
 0x1d0   : > { %v889_v35 = vpop.eup %888  ;;  %898 = vlog2.f32 %v734_v28  ;;  %v735_v37 = vadd.f32 -15.157552, %v510_v30  ;;  %v511_v38 = vsub.f32 %v479_v34, %v887_v31 }
 0x1d1   : > { %v525_v39 = vmul.f32 0.6931472, %v889_v35 }
 0x1d2   : > { %v891_v41 = vpop.eup %890  ;;  %900 = vlog2.f32 %v735_v37  ;;  %v736_v45 = vadd.f32 -15.157552, %v511_v38 }
 0x1d3   : > { %v538_v46 = vadd.f32 2.0, %v525_v39  ;;  %v527_v47 = vmul.f32 0.6931472, %v891_v41 }
 0x1d4   : > { %v893_v49 = vpop.eup %892  ;;  %902 = vlog2.f32 %v736_v45 }
 0x1d5   : > { %v597_v51 = vsel %vm589_vm3, %v538_v46, 0.0  ;;  %v539_v52 = vadd.f32 2.0, %v527_v47  ;;  %v521_v53 = vmul.f32 0.6931472, %v893_v49 }
 0x1d6   : > { %v895_v55 = vpop.eup %894  ;;  %605 = vst.msk [vmem:[%s1045_s13 + $0x10] sm:$0xff] %vm186_vm0, %v597_v51 }
 0x1d7   : > { %v598_v57 = vsel %vm590_vm5, %v539_v52, 0.0  ;;  %v536_v58 = vadd.f32 2.0, %v521_v53  ;;  %v523_v59 = vmul.f32 0.6931472, %v895_v55 }
 0x1d8   : > { %v897_v61 = vpop.eup %896  ;;  %606 = vst.msk [vmem:[%s1045_s13 + $0x18] sm:$0xff] %vm186_vm0, %v598_v57 }
 0x1d9   : > { %v595_v42 = vsel %vm587_vm9, %v536_v58, 0.0  ;;  %v537_v63 = vadd.f32 2.0, %v523_v59  ;;  %v529_v0 = vmul.f32 0.6931472, %v897_v61 }
 0x1da   : > { %v899_v2 = vpop.eup %898  ;;  %603 = vst.msk [vmem:[%s1045_s13] sm:$0xff] %vm186_vm0, %v595_v42 }
 0x1db   : > { %v596_v3 = vsel %vm588_vm10, %v537_v63, 0.0  ;;  %v540_v4 = vadd.f32 2.0, %v529_v0  ;;  %v531_v5 = vmul.f32 0.6931472, %v899_v2 }
 0x1dc   : > { %v901_v7 = vpop.eup %900  ;;  %604 = vst.msk [vmem:[%s1045_s13 + $0x8] sm:$0xff] %vm186_vm0, %v596_v3 }
 0x1dd   : > { %v599_v8 = vsel %vm591_vm12, %v540_v4, 0.0  ;;  %v541_v9 = vadd.f32 2.0, %v531_v5  ;;  %v533_v10 = vmul.f32 0.6931472, %v901_v7 }
 0x1de   : > { %v903_v12 = vpop.eup %902  ;;  %607 = vst.msk [vmem:[%s1045_s13 + $0x20] sm:$0xff] %vm186_vm0, %v599_v8 }
 0x1df   : > { %v600_v13 = vsel %vm592_vm14, %v541_v9, 0.0  ;;  %v542_v14 = vadd.f32 2.0, %v533_v10  ;;  %v535_v15 = vmul.f32 0.6931472, %v903_v12 }
 0x1e0   : > { %608 = vst.msk [vmem:[%s1045_s13 + $0x28] sm:$0xff] %vm186_vm0, %v600_v13 }
 0x1e1   : > { %v601_v16 = vsel %vm593_vm15, %v542_v14, 0.0  ;;  %v543_v17 = vadd.f32 2.0, %v535_v15 }
 0x1e2   : > { %609 = vst.msk [vmem:[%s1045_s13 + $0x30] sm:$0xff] %vm186_vm0, %v601_v16 }
 0x1e3   : > { %v602_v18 = vsel %vm594_vm1, %v543_v17, 0.0 }
 0x1e4   : > { %610 = vst.msk [vmem:[%s1045_s13 + $0x38] sm:$0xff] %vm186_vm0, %v602_v18 }
 0x1e5 PF: > { %s12_s11 = sadd.s32 1, %s926_s11   ;;  %s1080_s9 = smov %s922_s10 }
 0x1e6   : > { %p9_p5 = scmp.ge.s32.totalorder %s12_s11, 4   ;;  %s1081_s10 = smov %s1083_s12 }
 0x1e8   :  { %11 = sbr.rel (!%p9_p5) target bundleno = 2 (0x2), region = 69 }

</bundles_post_ra>
